<compile_context>
chip_gen: v6e
topology: v6e:2x2x1
jax: 0.10.0
libtpu: 0.0.40
codegen_flags: <defaults>
</compile_context>

<pallas_src>
import jax
import jax.numpy as jnp
from jax.experimental import pallas as pl
from jax.experimental.pallas import tpu as pltpu


def simple_nn_kernel(x_ref, w1_ref, b1_ref, w2_ref, b2_ref, o_ref):
    # Hoist bias loads (lane-dense (1, 128k) rows -> unmasked vregs).
    b1 = b1_ref[...]
    b2 = b2_ref[...]

    # Layer 1: Linear + ReLU (MXU matmul, f32 accumulation).
    h = jnp.dot(x_ref[...], w1_ref[...], preferred_element_type=jnp.float32) + b1
    h = jnp.maximum(h, 0.0)

    # Layer 2: Linear, then sigmoid(y)*4 + 1 == 2*tanh(y/2) + 3 (single EUP op).
    y = jnp.dot(h, w2_ref[...], preferred_element_type=jnp.float32) + b2
    o_ref[...] = (2.0 * jnp.tanh(0.5 * y) + 3.0).astype(o_ref.dtype)


def _round_up(n, m):
    return (n + m - 1) // m * m


def simple_nn_forward(x, w1, b1, w2, b2, *, tile_b=512):
    """y = sigmoid(relu(x @ w1 + b1) @ w2 + b2) * 4 + 1.

    Weights are stored transposed vs. PyTorch: w1 is (in, hidden), w2 is
    (hidden, out).  Biases may be (d,) or (1, d).
    """
    batch, in_size = x.shape
    hidden = w1.shape[1]
    out_size = w2.shape[1]

    # Lane-dense padded feature dims (multiples of 128).
    in_pad = _round_up(in_size, 128)
    hid_pad = _round_up(hidden, 128)
    out_pad = _round_up(out_size, 128)

    f32 = jnp.float32
    w1_pad = jnp.zeros((in_pad, hid_pad), f32).at[:in_size, :hidden].set(w1)
    b1_pad = jnp.zeros((1, hid_pad), f32).at[:, :hidden].set(b1.reshape(1, -1))
    w2_pad = jnp.zeros((hid_pad, out_pad), f32).at[:hidden, :out_size].set(w2)
    b2_pad = jnp.zeros((1, out_pad), f32).at[:, :out_size].set(b2.reshape(1, -1))

    if batch <= tile_b:
        # Launch-dominated regime: no grid at all, everything whole-array in VMEM.
        batch_pad = _round_up(batch, 8)  # full sublanes
        x_pad = jnp.zeros((batch_pad, in_pad), f32).at[:batch, :in_size].set(x)
        out = pl.pallas_call(
            simple_nn_kernel,
            out_shape=jax.ShapeDtypeStruct((batch_pad, out_pad), f32),
        )(x_pad, w1_pad, b1_pad, w2_pad, b2_pad)
        return out[:batch, :out_size]

    # Batch-tiled path: grid over batch only; weights/biases stay VMEM-resident
    # (index_map -> (0, 0)); "parallel" lets v7x's two TensorCores split the batch.
    batch_pad = _round_up(batch, tile_b)
    x_pad = jnp.zeros((batch_pad, in_pad), f32).at[:batch, :in_size].set(x)
    n_tiles = batch_pad // tile_b
    out = pl.pallas_call(
        simple_nn_kernel,
        out_shape=jax.ShapeDtypeStruct((batch_pad, out_pad), f32),
        grid_spec=pltpu.PrefetchScalarGridSpec(
            num_scalar_prefetch=0,
            grid=(n_tiles,),
            in_specs=[
                pl.BlockSpec((tile_b, in_pad), lambda i: (i, 0)),
                pl.BlockSpec((in_pad, hid_pad), lambda i: (0, 0)),
                pl.BlockSpec((1, hid_pad), lambda i: (0, 0)),
                pl.BlockSpec((hid_pad, out_pad), lambda i: (0, 0)),
                pl.BlockSpec((1, out_pad), lambda i: (0, 0)),
            ],
            out_specs=pl.BlockSpec((tile_b, out_pad), lambda i: (i, 0)),
        ),
        compiler_params=pltpu.CompilerParams(
            dimension_semantics=("parallel",)),
    )(x_pad, w1_pad, b1_pad, w2_pad, b2_pad)
    return out[:batch, :out_size]


def init_params(key, input_size, hidden_size, output_size):
    # Mimic nn.Linear's U(-1/sqrt(fan_in), 1/sqrt(fan_in)).
    k1, k2, k3, k4 = jax.random.split(key, 4)
    bound1 = 1.0 / jnp.sqrt(input_size)
    bound2 = 1.0 / jnp.sqrt(hidden_size)
    w1 = jax.random.uniform(k1, (input_size, hidden_size), jnp.float32, -bound1, bound1)
    b1 = jax.random.uniform(k2, (hidden_size,), jnp.float32, -bound1, bound1)
    w2 = jax.random.uniform(k3, (hidden_size, output_size), jnp.float32, -bound2, bound2)
    b2 = jax.random.uniform(k4, (output_size,), jnp.float32, -bound2, bound2)
    return w1, b1, w2, b2


def _reference(x, w1, b1, w2, b2):
    h = jnp.maximum(x @ w1 + b1.reshape(1, -1), 0.0)
    return jax.nn.sigmoid(h @ w2 + b2.reshape(1, -1)) * 4.0 + 1.0


if __name__ == "__main__":
    input_size, hidden_size, output_size = 16, 32, 8

    key = jax.random.PRNGKey(0)
    kx, kp, kx2 = jax.random.split(key, 3)
    w1, b1, w2, b2 = init_params(kp, input_size, hidden_size, output_size)

    # Small batch -> grid-free path (matches the original module's toy sizes).
    batch = 4
    x = jax.random.normal(kx, (batch, input_size), jnp.float32)
    out = simple_nn_forward(x, w1, b1, w2, b2)
    jax.block_until_ready(out)
    assert out.shape == (batch, output_size)
    assert jnp.allclose(out, _reference(x, w1, b1, w2, b2), atol=1e-5, rtol=1e-5)

    # Larger batch -> batch-tiled ("parallel") path, exercised for coverage.
    big_batch = 1000
    x_big = jax.random.normal(kx2, (big_batch, input_size), jnp.float32)
    out_big = simple_nn_forward(x_big, w1, b1, w2, b2, tile_b=256)
    jax.block_until_ready(out_big)
    assert out_big.shape == (big_batch, output_size)
    assert jnp.allclose(out_big, _reference(x_big, w1, b1, w2, b2), atol=1e-5, rtol=1e-5)

    print("KERNEL_OK")
</pallas_src>

<mosaic_0001>
module attributes {stable_mosaic.version = 11 : i64} {
  func.func @simple_nn_kernel(%arg0: memref<8x128xf32, #tpu.memory_space<vmem>>, %arg1: memref<128x128xf32, #tpu.memory_space<vmem>>, %arg2: memref<1x128xf32, #tpu.memory_space<vmem>>, %arg3: memref<128x128xf32, #tpu.memory_space<vmem>>, %arg4: memref<1x128xf32, #tpu.memory_space<vmem>>, %arg5: memref<8x128xf32, #tpu.memory_space<vmem>>) attributes {dimension_semantics = [], scalar_prefetch = 0 : i64, scratch_operands = 0 : i64, tpu.core_type = #tpu.core_type<tc>} {
    %c0 = arith.constant 0 : index
    %c0_0 = arith.constant 0 : index
    %0 = vector.load %arg2[%c0, %c0_0] : memref<1x128xf32, #tpu.memory_space<vmem>>, vector<1x128xf32>
    %c0_1 = arith.constant 0 : index
    %c0_2 = arith.constant 0 : index
    %1 = vector.load %arg4[%c0_1, %c0_2] : memref<1x128xf32, #tpu.memory_space<vmem>>, vector<1x128xf32>
    %c0_3 = arith.constant 0 : index
    %c0_4 = arith.constant 0 : index
    %2 = vector.load %arg0[%c0_3, %c0_4] : memref<8x128xf32, #tpu.memory_space<vmem>>, vector<8x128xf32>
    %c0_5 = arith.constant 0 : index
    %c0_6 = arith.constant 0 : index
    %3 = vector.load %arg1[%c0_5, %c0_6] : memref<128x128xf32, #tpu.memory_space<vmem>>, vector<128x128xf32>
    %cst = arith.constant dense<0.000000e+00> : vector<8x128xf32>
    %4 = tpu.matmul %2, %3, %cst {dimension_numbers = #tpu.dot_dimension_numbers<[1], [0], [0], [1], [0, 0, 1, 1], [], []>} : vector<8x128xf32>, vector<128x128xf32>, vector<8x128xf32> -> vector<8x128xf32>
    %5 = vector.broadcast %0 : vector<1x128xf32> to vector<8x128xf32>
    %6 = arith.addf %4, %5 : vector<8x128xf32>
    %cst_7 = arith.constant 0.000000e+00 : f32
    %7 = vector.broadcast %cst_7 : f32 to vector<8x128xf32>
    %8 = arith.maximumf %6, %7 : vector<8x128xf32>
    %c0_8 = arith.constant 0 : index
    %c0_9 = arith.constant 0 : index
    %9 = vector.load %arg3[%c0_8, %c0_9] : memref<128x128xf32, #tpu.memory_space<vmem>>, vector<128x128xf32>
    %cst_10 = arith.constant dense<0.000000e+00> : vector<8x128xf32>
    %10 = tpu.matmul %8, %9, %cst_10 {dimension_numbers = #tpu.dot_dimension_numbers<[1], [0], [0], [1], [0, 0, 1, 1], [], []>} : vector<8x128xf32>, vector<128x128xf32>, vector<8x128xf32> -> vector<8x128xf32>
    %11 = vector.broadcast %1 : vector<1x128xf32> to vector<8x128xf32>
    %12 = arith.addf %10, %11 : vector<8x128xf32>
    %cst_11 = arith.constant 5.000000e-01 : f32
    %13 = vector.broadcast %cst_11 : f32 to vector<8x128xf32>
    %14 = arith.mulf %13, %12 : vector<8x128xf32>
    %15 = math.tanh %14 : vector<8x128xf32>
    %cst_12 = arith.constant 2.000000e+00 : f32
    %16 = vector.broadcast %cst_12 : f32 to vector<8x128xf32>
    %17 = arith.mulf %16, %15 : vector<8x128xf32>
    %cst_13 = arith.constant 3.000000e+00 : f32
    %18 = vector.broadcast %cst_13 : f32 to vector<8x128xf32>
    %19 = arith.addf %17, %18 : vector<8x128xf32>
    %c0_14 = arith.constant 0 : index
    %c0_15 = arith.constant 0 : index
    %20 = vector.load %arg5[%c0_14, %c0_15] : memref<8x128xf32, #tpu.memory_space<vmem>>, vector<8x128xf32>
    tpu.vector_store %arg5[%c0_14, %c0_15], %19 {strides = array<i32>} : memref<8x128xf32, #tpu.memory_space<vmem>>, vector<8x128xf32>,
    return
  }
}

</mosaic_0001>

<bundles_post_ra>
// kernel: tpu_custom_call.1
= control target key start
LH: loop header
LB: loop body
LE: loop exit
PB: predicated region body
PF: predicated region fallthrough
CT: control target
= control target key end

     0   :  { %10 = vsyncpa [#allocation3], 0  ;;  %s561_s0 = inlined_call_operand.hbm [shape: f32[8,128], index: 0, kind: input, shape index: {}]   ;;  %s562_s1 = inlined_call_operand.hbm [shape: f32[128,128], index: 1, kind: input, shape index: {}]   ;;  %s563_s2 = inlined_call_operand.vmem [shape: f32[1,128], index: 2, kind: input, shape index: {}]   ;;  %s564_s3 = inlined_call_operand.hbm [shape: f32[128,128], index: 3, kind: input, shape index: {}]   ;;  %s565_s4 = inlined_call_operand.vmem [shape: f32[1,128], index: 4, kind: input, shape index: {}]   ;;  %s566_s5 = inlined_call_operand.hbm [shape: f32[8,128], index: 5, kind: output, shape index: {}]  }
   0x1   :  { %11 = vsyncpa [#allocation6], 0 }
   0x2   :  { %12 = vsyncpa [#allocation4], 0  ;;  %s471_s18 = smov [#allocation5]  }
   0x3   :  { %s28_s19 = sshll.u32 %s471_s18, 4  ;;  %s29_s19 = int_to_ptr.vmem [resolvable:$true] %s28_s19 }
   0x4   :  { %s393_s20 = scalar_lea.vmem %s29_s19, 2048  ;;  %p398_p1 = scmp.lt.s32.totalorder %s29_s19, %s29_s19 }
   0x5   :  { %p394_p0 = scmp.ne.s32.totalorder %s29_s19, %s393_s20  ;;  %p399_p2 = scmp.lt.s32.totalorder %s393_s20, %s393_s20 }
   0x7   :  { %p400_p3 = por %p399_p2, %p398_p1 }
   0x9   :  { %p401_p4 = pnand %p400_p3, %p394_p0 }
   0xb   :  { %404 = shalt.err (!%p401_p4)
}
   0xc   :  { %s472_s21 = smov 128   ;;  %s473_s22 = smov 8  }
   0xd   :  { %34 = dma.hbm_to_vmem [thread:$0]  %s562_s1, 2048, %s29_s19, [#allocation6], %s472_s21, %s472_s21, %s473_s22  }
   0xe   :  { %s474_s25 = smov [#allocation2]   ;;  %s475_s27 = smov [#allocation7]  }
   0xf   :  { %s19_s26 = sshll.u32 %s474_s25, 4  ;;  %s42_s28 = sshll.u32 %s475_s27, 4  ;;  %s20_s26 = int_to_ptr.vmem [resolvable:$true] %s19_s26  ;;  %s43_s28 = int_to_ptr.vmem [resolvable:$true] %s42_s28 }
  0x10   :  { %s413_s29 = scalar_lea.vmem %s20_s26, 128  ;;  %p418_p6 = scmp.lt.s32.totalorder %s20_s26, %s20_s26 }
  0x11   :  { %p414_p5 = scmp.ne.s32.totalorder %s20_s26, %s413_s29  ;;  %p419_p7 = scmp.lt.s32.totalorder %s413_s29, %s413_s29 }
  0x13   :  { %p420_p8 = por %p419_p7, %p418_p6 }
  0x15   :  { %p421_p9 = pnand %p420_p8, %p414_p5 }
  0x17   :  { %424 = shalt.err (!%p421_p9)
}
  0x18   :  { %22 = dma.hbm_to_vmem [thread:$0]  %s561_s0, 128, %s20_s26, [#allocation3]  }
  0x19   :  { %s433_s7 = scalar_lea.vmem %s43_s28, 2048  ;;  %p438_p11 = scmp.lt.s32.totalorder %s43_s28, %s43_s28 }
  0x1a   :  { %p434_p10 = scmp.ne.s32.totalorder %s43_s28, %s433_s7  ;;  %p439_p12 = scmp.lt.s32.totalorder %s433_s7, %s433_s7 }
  0x1c   :  { %p440_p13 = por %p439_p12, %p438_p11 }
  0x1e   :  { %p441_p0 = pnand %p440_p13, %p434_p10 }
  0x20   :  { %444 = shalt.err (!%p441_p0)
}
  0x21   :  { %48 = dma.hbm_to_vmem [thread:$0]  %s564_s3, 2048, %s43_s28, [#allocation6], %s472_s21, %s472_s21, %s473_s22  }
  0x22   :  { %465 = dma.done.wait [#allocation3], 128  }
  0x23   :  { %466 = vsyncadd [#allocation3], 4294967168 }
  0x24   :  { %467 = dma.done.wait [#allocation6], 4096  }
  0x25   :  { %468 = vsyncadd [#allocation6], 4294963200  ;;  %v476_v0 = vmov 0.0   ;;  %vm477_vm0 = vmmov 0   ;;  %v78_v1 = vld [vmem:[#allocation5 + $0x78] sm:$0xff]  ;;  %v77_v2 = vld [vmem:[#allocation5 + $0x70] sm:$0xff] }
  0x26   :  { %305 = vmatprep.subr.mxu0 %v476_v0  ;;  %337 = vmatprep.mubr.msk.f32.mxu0 %vm477_vm0, %v476_v0  ;;  %v76_v3 = vld [vmem:[#allocation5 + $0x68] sm:$0xff]  ;;  %v75_v4 = vld [vmem:[#allocation5 + $0x60] sm:$0xff]  ;;  %v171_v5 = vld [vmem:[#allocation7 + $0x78] sm:$0xff]  ;;  %s478_s11 = smov [#allocation8]  }
  0x27   :  { %340 = vmatprep.subr.mxu1 %v476_v0  ;;  %372 = vmatprep.mubr.msk.f32.mxu1 %vm477_vm0, %v476_v0  ;;  %v74_v6 = vld [vmem:[#allocation5 + $0x58] sm:$0xff]  ;;  %v170_v7 = vld [vmem:[#allocation7 + $0x70] sm:$0xff]  ;;  %v169_v8 = vld [vmem:[#allocation7 + $0x68] sm:$0xff]  ;;  %s259_s12 = sshll.u32 %s478_s11, 4  ;;  %s260_s12 = int_to_ptr.vmem [resolvable:$true] %s259_s12 }
  0x28   :  { %306 = vmatpush3.msra.mxu0 %v78_v1  ;;  %341 = vmatpush3.msra.mxu1 %v171_v5  ;;  %v73_v9 = vld [vmem:[#allocation5 + $0x50] sm:$0xff]  ;;  %v168_v10 = vld [vmem:[#allocation7 + $0x60] sm:$0xff]  ;;  %v72_v11 = vld [vmem:[#allocation5 + $0x48] sm:$0xff]  ;;  %p450_p2 = scmp.lt.s32.totalorder %s260_s12, %s260_s12 }
  0x29   :  { %307 = vmatprep.subr.mxu0 %v476_v0  ;;  %342 = vmatprep.subr.mxu1 %v476_v0  ;;  %v167_v12 = vld [vmem:[#allocation7 + $0x58] sm:$0xff]  ;;  %v71_v13 = vld [vmem:[#allocation5 + $0x40] sm:$0xff]  ;;  %v166_v14 = vld [vmem:[#allocation7 + $0x50] sm:$0xff] }
  0x2a   :  { %308 = vmatpush3.msra.mxu0 %v77_v2  ;;  %343 = vmatpush3.msra.mxu1 %v170_v7  ;;  %v70_v15 = vld [vmem:[#allocation5 + $0x38] sm:$0xff]  ;;  %v165_v16 = vld [vmem:[#allocation7 + $0x48] sm:$0xff]  ;;  %v69_v17 = vld [vmem:[#allocation5 + $0x30] sm:$0xff] }
  0x2b   :  { %309 = vmatprep.subr.mxu0 %v476_v0  ;;  %344 = vmatprep.subr.mxu1 %v476_v0  ;;  %v164_v18 = vld [vmem:[#allocation7 + $0x40] sm:$0xff]  ;;  %v68_v19 = vld [vmem:[#allocation5 + $0x28] sm:$0xff]  ;;  %v163_v20 = vld [vmem:[#allocation7 + $0x38] sm:$0xff] }
  0x2c   :  { %310 = vmatpush3.msra.mxu0 %v76_v3  ;;  %345 = vmatpush3.msra.mxu1 %v169_v8  ;;  %v67_v21 = vld [vmem:[#allocation5 + $0x20] sm:$0xff]  ;;  %v162_v22 = vld [vmem:[#allocation7 + $0x30] sm:$0xff]  ;;  %v66_v23 = vld [vmem:[#allocation5 + $0x18] sm:$0xff] }
  0x2d   :  { %311 = vmatprep.subr.mxu0 %v476_v0  ;;  %346 = vmatprep.subr.mxu1 %v476_v0  ;;  %v161_v24 = vld [vmem:[#allocation7 + $0x28] sm:$0xff]  ;;  %v65_v25 = vld [vmem:[#allocation5 + $0x10] sm:$0xff]  ;;  %v160_v26 = vld [vmem:[#allocation7 + $0x20] sm:$0xff] }
  0x2e   :  { %312 = vmatpush3.msra.mxu0 %v75_v4  ;;  %347 = vmatpush3.msra.mxu1 %v168_v10  ;;  %v64_v27 = vld [vmem:[#allocation5 + $0x8] sm:$0xff]  ;;  %v159_v28 = vld [vmem:[#allocation7 + $0x18] sm:$0xff]  ;;  %v63_v29 = vld [vmem:[#allocation5] sm:$0xff] }
  0x2f   :  { %313 = vmatprep.subr.mxu0 %v476_v0  ;;  %348 = vmatprep.subr.mxu1 %v476_v0  ;;  %v62_v30 = vld [vmem:[#allocation2] sm:$0xff]  ;;  %v158_v31 = vld [vmem:[#allocation7 + $0x10] sm:$0xff]  ;;  %v157_v32 = vld [vmem:[#allocation7 + $0x8] sm:$0xff] }
  0x30   :  { %314 = vmatpush3.msra.mxu0 %v74_v6  ;;  %349 = vmatpush3.msra.mxu1 %v167_v12  ;;  %v156_v33 = vld [vmem:[#allocation7] sm:$0xff]  ;;  %v269_v34 = vld [vmem:[%s563_s2] ss:$0 sm:$0xff]  ;;  %s445_s2 = scalar_lea.vmem %s260_s12, 128 }
  0x31   :  { %315 = vmatprep.subr.mxu0 %v476_v0  ;;  %350 = vmatprep.subr.mxu1 %v476_v0  ;;  %v270_v39 = vld [vmem:[%s565_s4] ss:$0 sm:$0xff]  ;;  %p446_p1 = scmp.ne.s32.totalorder %s260_s12, %s445_s2  ;;  %p451_p3 = scmp.lt.s32.totalorder %s445_s2, %s445_s2 }
  0x32   :  { %316 = vmatpush3.msra.mxu0 %v73_v9  ;;  %351 = vmatpush3.msra.mxu1 %v166_v14 }
  0x33   :  { %317 = vmatprep.subr.mxu0 %v476_v0  ;;  %352 = vmatprep.subr.mxu1 %v476_v0  ;;  %p452_p4 = por %p451_p3, %p450_p2 }
  0x34   :  { %318 = vmatpush3.msra.mxu0 %v72_v11  ;;  %353 = vmatpush3.msra.mxu1 %v165_v16 }
  0x35   :  { %319 = vmatprep.subr.mxu0 %v476_v0  ;;  %354 = vmatprep.subr.mxu1 %v476_v0  ;;  %p453_p5 = pnand %p452_p4, %p446_p1 }
  0x36   :  { %320 = vmatpush3.msra.mxu0 %v71_v13  ;;  %355 = vmatpush3.msra.mxu1 %v164_v18 }
  0x37   :  { %321 = vmatprep.subr.mxu0 %v476_v0  ;;  %356 = vmatprep.subr.mxu1 %v476_v0 }
  0x38   :  { %322 = vmatpush3.msra.mxu0 %v70_v15  ;;  %357 = vmatpush3.msra.mxu1 %v163_v20 }
  0x39   :  { %323 = vmatprep.subr.mxu0 %v476_v0  ;;  %358 = vmatprep.subr.mxu1 %v476_v0 }
  0x3a   :  { %324 = vmatpush3.msra.mxu0 %v69_v17  ;;  %359 = vmatpush3.msra.mxu1 %v162_v22 }
  0x3b   :  { %325 = vmatprep.subr.mxu0 %v476_v0  ;;  %360 = vmatprep.subr.mxu1 %v476_v0 }
  0x3c   :  { %326 = vmatpush3.msra.mxu0 %v68_v19  ;;  %361 = vmatpush3.msra.mxu1 %v161_v24 }
  0x3d   :  { %327 = vmatprep.subr.mxu0 %v476_v0  ;;  %362 = vmatprep.subr.mxu1 %v476_v0 }
  0x3e   :  { %328 = vmatpush3.msra.mxu0 %v67_v21  ;;  %363 = vmatpush3.msra.mxu1 %v160_v26 }
  0x3f   :  { %329 = vmatprep.subr.mxu0 %v476_v0  ;;  %364 = vmatprep.subr.mxu1 %v476_v0 }
  0x40   :  { %330 = vmatpush3.msra.mxu0 %v66_v23  ;;  %365 = vmatpush3.msra.mxu1 %v159_v28 }
  0x41   :  { %331 = vmatprep.subr.mxu0 %v476_v0  ;;  %366 = vmatprep.subr.mxu1 %v476_v0 }
  0x42   :  { %332 = vmatpush3.msra.mxu0 %v65_v25  ;;  %367 = vmatpush3.msra.mxu1 %v158_v31 }
  0x43   :  { %333 = vmatprep.subr.mxu0 %v476_v0  ;;  %368 = vmatprep.subr.mxu1 %v476_v0 }
  0x44   :  { %334 = vmatpush3.msra.mxu0 %v64_v27  ;;  %369 = vmatpush3.msra.mxu1 %v157_v32 }
  0x45   :  { %335 = vmatprep.subr.mxu0 %v476_v0  ;;  %370 = vmatprep.subr.mxu1 %v476_v0 }
  0x46   :  { %336 = vmatpush3.msra.mxu0 %v63_v29  ;;  %371 = vmatpush3.msra.mxu1 %v156_v33 }
  0x47   :  { %338 = vmatmul.mubr.f32.vlgmr.msra.gmra.mxu0 %v62_v30 }
 0x107   :  { %v151_v35 = vpop.f32.mrf.mxu0 }
 0x108   :  { %v152_v36 = vadd.f32 %v269_v34, %v151_v35 }
 0x109   :  { %v339_v37 = vpop.f32.mrf.mxu0 }
 0x10a   :  { %v155_v38 = vmax.f32 %v152_v36, 0.0 }
 0x10c   :  { %373 = vmatmul.mubr.f32.vlgmr.msra.gmra.mxu1 %v155_v38 }
 0x1cc   :  { %v244_v40 = vpop.f32.mrf.mxu1 }
 0x1cd   :  { %v245_v41 = vadd.f32 %v270_v39, %v244_v40 }
 0x1ce   :  { %v374_v42 = vpop.f32.mrf.mxu1 }
 0x1cf   :  { %v248_v43 = vmul.f32 0.5, %v245_v41 }
 0x1d1   :  { %383 = vtanh.f32 %v248_v43 }
 0x1de   :  { %v384_v44 = vpop.eup %383 }
 0x1df   :  { %v250_v45 = vmul.f32 2.0, %v384_v44 }
 0x1e1   :  { %v251_v46 = vadd.f32 3.0, %v250_v45 }
 0x1e3   :  { %252 = vst [vmem:[#allocation8] sm:$0xff] %v251_v46 }
 0x1e4   :  { %456 = shalt.err (!%p453_p5)
}
 0x1e5   :  { %262 = dma.vmem_to_hbm [thread:$0]  %s260_s12, 128, %s566_s5, [#allocation4]  }
 0x1e6   :  { %469 = dma.done.wait [#allocation4], 128  }
 0x1e7   :  { %470 = vsyncadd [#allocation4], 4294967168 }
 0x1e8   :  { %266 = vsyncpa [#allocation3], 1 }
 0x1e9   :  { %267 = vsyncpa [#allocation6], 1 }
 0x1ea   :  { %268 = vsyncpa [#allocation4], 1 }

</bundles_post_ra>
